<compile_context>
chip_gen: v5e
topology: v5e:2x2
jax: 0.10.0
libtpu: 0.0.40
codegen_flags: <defaults>
</compile_context>

<pallas_src>
import math
import numpy as np
import jax
import jax.numpy as jnp
from jax import lax
from jax.experimental import pallas as pl
from jax.experimental.pallas import tpu as pltpu

B0, BETA, RM, DT = 0.01, 1.8, 1.0, 1.0   # AdaptiveLIF constants (module defaults)

LANE = 128   # lane width  -> hidden/class dims padded to a multiple of this
SUB = 8      # sublanes    -> batch tiles are multiples of this


def _round_up(x, m):
    return ((x + m - 1) // m) * m


def _pad_axis(a, axis, new_size):
    if a.shape[axis] == new_size:
        return a
    pad = [(0, 0)] * a.ndim
    pad[axis] = (0, new_size - a.shape[axis])
    return jnp.pad(a, pad)


def _tpu_generation():
    try:
        kind = jax.devices()[0].device_kind.lower()
    except Exception:
        return 6
    for g in (7, 6, 5, 4):
        if ("v%d" % g) in kind:
            return g
    return 6


def _chip_config():
    gen = _tpu_generation()
    if gen >= 7:    # 64 MiB VMEM / core, 2 TensorCores / chip, 256-wide MXU
        return dict(vmem_limit=48 * 2**20, tile_budget=36 * 2**20,
                    bt_target=256, tn_target=256, two_core=True)
    if gen == 6:    # 128 MiB VMEM, 256-wide MXU -> push tiles up
        return dict(vmem_limit=96 * 2**20, tile_budget=72 * 2**20,
                    bt_target=256, tn_target=256, two_core=False)
    if gen == 5:    # v5e: 128-wide MXUs, conservative scoped VMEM
        return dict(vmem_limit=64 * 2**20, tile_budget=48 * 2**20,
                    bt_target=128, tn_target=128, two_core=False)
    return dict(vmem_limit=32 * 2**20, tile_budget=24 * 2**20,
                bt_target=128, tn_target=128, two_core=False)


def _pick_tiles(T, B, t_max, max_h, max_in, mm_bytes, cfg):
    """Pick (bt, Bp, tc) so both kernels' resident VMEM stays within the generation budget."""
    Bp0 = _round_up(max(B, 1), SUB)
    bt = min(Bp0, cfg["bt_target"])
    # v7x: make sure the "parallel" batch axis has >= 2 tiles so both TensorCores get work.
    if cfg["two_core"] and Bp0 // bt < 2 and Bp0 >= 2 * SUB:
        bt = _round_up(Bp0 // 2, SUB)
    Bp = _round_up(Bp0, bt)
    Hp = _round_up(max_h, LANE)
    inx = max(max_in, Hp)
    tn = cfg["tn_target"] if Hp % cfg["tn_target"] == 0 else LANE

    budget = cfg["tile_budget"]
    # serial kernel: whh (2 buffers) + circular spike history + u/eta ; per-timestep chunk cost
    fixed_s = 2 * t_max * Hp * Hp * mm_bytes + t_max * bt * Hp * mm_bytes + 2 * bt * Hp * 4
    per_s = bt * Hp * (2 * 4 + 2 * mm_bytes)
    # FF kernel: weight/bias blocks ; per-timestep = x cur/prev (+halo scratch) + acc + out
    fixed_f = 2 * inx * tn * mm_bytes + 4 * tn * 4
    per_f = bt * (6 * inx * mm_bytes + 3 * tn * 4)
    tc = min((budget - fixed_s) // max(per_s, 1),
             (budget - fixed_f) // max(per_f, 1))
    tc = int(max(tc, t_max, 2))
    tc = min(tc, 512, _round_up(max(T, 2), 2))
    tc = max(tc, t_max)          # the FF prev/cur halo trick needs tc >= t_max
    tc = _round_up(tc, 2)        # even, so the fori_loop unroll=2 divides evenly
    return bt, Bp, tc


# ----------------------------------------------------------------------------------
# Kernel 1: feed-forward delayed synapse.
#   grid = (time-chunk i, batch-tile bk, N-tile j, delay d["arbitrary" reduction])
#   For block i we hold x blocks i-1 ("prev") and i ("cur") -> any shift d <= tc is a
#   dynamic slice of the halo scratch; the delay stack is never materialised in HBM.
# ----------------------------------------------------------------------------------
def _make_ff_kernel(tc, bt, inx, tn, t_max, precision):
    def kernel(xp_ref, xc_ref, w_ref, btot_ref, b0_ref, o_ref, acc_ref, xx_ref):
        i = pl.program_id(0)
        d = pl.program_id(3)

        @pl.when(d == 0)
        def _init():
            # assemble the (prev | cur) time halo; timesteps < 0 are zero
            @pl.when(i == 0)
            def _():
                xx_ref[0:tc] = jnp.zeros((tc, bt, inx), xx_ref.dtype)

            @pl.when(i > 0)
            def _():
                xx_ref[0:tc] = xp_ref[...]

            xx_ref[tc:2 * tc] = xc_ref[...]

            # bias init of the f32 accumulator (recurrent bias is pre-fused for t >= 1)
            acc_ref[...] = jnp.broadcast_to(btot_ref[...], (tc * bt, tn))

            @pl.when(i == 0)
            def _():
                # global timestep 0 never receives the recurrent bias
                acc_ref[0:bt, :] = jnp.broadcast_to(b0_ref[...], (bt, tn))

        # rows shifted by d timesteps: xx rows [tc - d, 2*tc - d)
        lhs = xx_ref[pl.ds(tc - d, tc)].reshape(tc * bt, inx)
        acc_ref[...] += jnp.dot(lhs, w_ref[0],
                                preferred_element_type=jnp.float32,
                                precision=precision)

        @pl.when(d == t_max - 1)
        def _store():
            o_ref[...] = acc_ref[...].reshape(tc, bt, tn)

    return kernel


def _ff_delayed_matmul(x, wd, b_total, b_first, *, tc, bt, tn, t_max, precision, cfg):
    T_pad, Bp, inx = x.shape
    Hp = wd.shape[2]
    kernel = _make_ff_kernel(tc, bt, inx, tn, t_max, precision)
    grid = (T_pad // tc, Bp // bt, Hp // tn, t_max)
    return pl.pallas_call(
        kernel,
        out_shape=jax.ShapeDtypeStruct((T_pad, Bp, Hp), jnp.float32),
        grid_spec=pltpu.PrefetchScalarGridSpec(
            num_scalar_prefetch=0,
            grid=grid,
            in_specs=[
                pl.BlockSpec((tc, bt, inx),
                             lambda i, bk, j, d: (jnp.maximum(i - 1, 0), bk, 0)),
                pl.BlockSpec((tc, bt, inx), lambda i, bk, j, d: (i, bk, 0)),
                pl.BlockSpec((1, inx, tn), lambda i, bk, j, d: (d, 0, j)),
                pl.BlockSpec((1, tn), lambda i, bk, j, d: (0, j)),
                pl.BlockSpec((1, tn), lambda i, bk, j, d: (0, j)),
            ],
            out_specs=pl.BlockSpec((tc, bt, tn), lambda i, bk, j, d: (i, bk, j)),
            scratch_shapes=[pltpu.VMEM((tc * bt, tn), jnp.float32),    # accumulator
                            pltpu.VMEM((2 * tc, bt, inx), x.dtype)],   # time halo
        ),
        compiler_params=pltpu.CompilerParams(
            dimension_semantics=("parallel", "parallel", "parallel", "arbitrary"),
            vmem_limit_bytes=cfg["vmem_limit"]),
    )(x, x, wd, b_total, b_first)


# ----------------------------------------------------------------------------------
# Kernel 2: true recurrence — delayed hh synapse (optional) + AdaptiveLIF.
#   grid = (batch-tile "parallel", time-chunk "arbitrary"); u/eta/history are persistent
#   VMEM scratch, re-initialised at chunk 0.  History is a circular buffer (no shifts).
# ----------------------------------------------------------------------------------
def _make_serial_kernel(tc, bt, Hp, t_max, has_rec, precision):
    def kernel(*refs):
        if has_rec:
            y_ref, whh_ref, alpha_ref, rho_ref, o_ref, u_sc, eta_sc, hist_sc = refs
        else:
            y_ref, alpha_ref, rho_ref, o_ref, u_sc, eta_sc = refs
            whh_ref = hist_sc = None

        c = pl.program_id(1)

        @pl.when(c == 0)
        def _():
            u_sc[...] = jnp.zeros_like(u_sc)
            eta_sc[...] = jnp.zeros_like(eta_sc)
            if has_rec:
                hist_sc[...] = jnp.zeros_like(hist_sc)

        # loop-invariant loads (kept [1, Hp] so they stay in a handful of vregs)
        alpha = alpha_ref[...]
        rho = rho_ref[...]
        one_m_alpha = 1.0 - alpha
        one_m_rho = 1.0 - rho
        t0 = c * tc

        def step(s, carry):
            t = t0 + s                       # global timestep
            y = y_ref[s]                     # [bt, Hp] f32 (bias already folded in)
            if has_rec:
                for d in range(t_max):       # static, unrolled
                    # spike at time t-1-d lives in circular slot (t-1-d) mod t_max;
                    # unwritten slots (t-1-d < 0) are still zero -> contribute nothing.
                    slot = (t + (t_max - 1 - d)) % t_max
                    y = y + jnp.dot(hist_sc[slot], whh_ref[d],
                                    preferred_element_type=jnp.float32,
                                    precision=precision)

            # AdaptiveLIF update (f32)
            u = u_sc[...] * alpha + one_m_alpha * (RM * y)
            eta = eta_sc[...]
            vth = B0 + BETA * eta
            spk = (u - vth > 0.0).astype(jnp.float32)   # Heaviside forward
            u_sc[...] = u - spk * (eta * BETA + B0)
            eta_sc[...] = rho * eta + one_m_rho * spk
            o_ref[s] = spk.astype(o_ref.dtype)
            if has_rec:
                hist_sc[t % t_max] = spk.astype(hist_sc.dtype)
            return carry

        lax.fori_loop(0, tc, step, 0, unroll=2)

    return kernel


def _serial_lif(y_drive, whh, alpha, rho, *, tc, bt, t_max, out_dtype, precision, cfg):
    T_pad, Bp, Hp = y_drive.shape
    has_rec = whh is not None
    kernel = _make_serial_kernel(tc, bt, Hp, t_max, has_rec, precision)

    in_arrays = [y_drive]
    in_specs = [pl.BlockSpec((tc, bt, Hp), lambda b, c: (c, b, 0))]
    if has_rec:
        in_arrays.append(whh)
        in_specs.append(pl.BlockSpec((t_max, Hp, Hp), lambda b, c: (0, 0, 0)))
    in_arrays += [alpha, rho]
    in_specs += [pl.BlockSpec((1, Hp), lambda b, c: (0, 0)),
                 pl.BlockSpec((1, Hp), lambda b, c: (0, 0))]

    scratch = [pltpu.VMEM((bt, Hp), jnp.float32),       # membrane potential u
               pltpu.VMEM((bt, Hp), jnp.float32)]       # adaptation eta
    if has_rec:
        scratch.append(pltpu.VMEM((t_max, bt, Hp), out_dtype))   # circular spike history

    return pl.pallas_call(
        kernel,
        out_shape=jax.ShapeDtypeStruct((T_pad, Bp, Hp), out_dtype),
        grid_spec=pltpu.PrefetchScalarGridSpec(
            num_scalar_prefetch=0,
            grid=(Bp // bt, T_pad // tc),
            in_specs=in_specs,
            out_specs=pl.BlockSpec((tc, bt, Hp), lambda b, c: (c, b, 0)),
            scratch_shapes=scratch,
        ),
        compiler_params=pltpu.CompilerParams(
            dimension_semantics=("parallel", "arbitrary"),
            vmem_limit_bytes=cfg["vmem_limit"]),
    )(*in_arrays)


# ----------------------------------------------------------------------------------
# One delayed block (recurrent if wd_hh is not None): FF GEMM + serial LIF kernel.
# x: [T_pad, Bp, INx] time-major in the matmul dtype. Returns spikes [T_pad, Bp, Hp].
# ----------------------------------------------------------------------------------
def _run_block(x, wd_in, b_in, wd_hh, b_hh, alpha, rho, *,
               t_max, tc, bt, tn_target, mm_dtype, cfg):
    T_pad, Bp, inx = x.shape
    H = wd_in.shape[2]
    Hp = _round_up(H, LANE)
    tn = tn_target if Hp % tn_target == 0 else LANE
    has_rec = wd_hh is not None
    precision = lax.Precision.HIGHEST if mm_dtype == jnp.float32 else None

    # zero-pad parameters: padded hidden units provably never spike
    wd_in_p = _pad_axis(_pad_axis(wd_in, 1, inx), 2, Hp).astype(mm_dtype)  # [t_max, inx, Hp]
    b_first = _pad_axis(b_in, 1, Hp).astype(jnp.float32)
    if has_rec:
        b_total = b_first + _pad_axis(b_hh, 1, Hp).astype(jnp.float32)     # hh bias hoisted
        whh_p = _pad_axis(_pad_axis(wd_hh, 1, Hp), 2, Hp).astype(mm_dtype)
    else:
        b_total = b_first
        whh_p = None
    alpha_p = _pad_axis(alpha, 1, Hp).astype(jnp.float32)
    rho_p = _pad_axis(rho, 1, Hp).astype(jnp.float32)

    y_ff = _ff_delayed_matmul(x, wd_in_p, b_total, b_first, tc=tc, bt=bt, tn=tn,
                              t_max=t_max, precision=precision, cfg=cfg)
    return _serial_lif(y_ff, whh_p, alpha_p, rho_p, tc=tc, bt=bt, t_max=t_max,
                       out_dtype=mm_dtype, precision=precision, cfg=cfg)


# ----------------------------------------------------------------------------------
# Parameter initialization (deterministic; mirrors shapes of the PyTorch module).
# Weights are snapped to a 1/64 grid so every matmul in the small test is EXACT in both
# bf16 and f32 -> the kernel-vs-reference spike comparison is deterministic (no threshold
# flips from rounding).
# ----------------------------------------------------------------------------------
def init_delayed_synapse(key, in_f, out_f, t_max, sparsity, zero_weight=False):
    kw, kb, kd = jax.random.split(key, 3)
    bound = 1.0 / math.sqrt(in_f)
    W = jax.random.uniform(kw, (out_f, in_f), jnp.float32, -bound, bound)
    W = jnp.round(W * 64.0) / 64.0
    if zero_weight:
        W = jnp.zeros_like(W)            # matches nn.init.zeros_(sparse_hh.weight)
    b = jax.random.uniform(kb, (out_f,), jnp.float32, -bound, bound)
    b = jnp.round(b * 64.0) / 64.0
    thr = jnp.percentile(jnp.abs(W), 100.0 * (1.0 - sparsity))
    mask = (jnp.abs(W) >= thr).astype(jnp.float32)
    delay = jax.random.randint(kd, (in_f, out_f), 0, t_max)
    w_eff = (W * mask).T                                           # [in, out]
    one_hot = (delay[None] == jnp.arange(t_max)[:, None, None]).astype(jnp.float32)
    wd = one_hot * w_eff[None]                                     # [t_max, in, out]
    return wd, b.reshape(1, out_f)


def init_lif(key, size):
    k1, k2 = jax.random.split(key)
    tau_m = 200.0 + 25.0 * jax.random.normal(k1, (size,), jnp.float32)
    tau_adp = 20.0 + 5.0 * jax.random.normal(k2, (size,), jnp.float32)
    alpha = jnp.exp(-DT / tau_m).reshape(1, size)
    rho = jnp.exp(-DT / tau_adp).reshape(1, size)
    return alpha, rho


def init_drsnn(key, t_max, layers, num_classes, sparsity, zero_hh=True):
    params = {"blocks": [], "fc": None}
    for i in range(1, len(layers)):
        key, k1, k2, k3 = jax.random.split(key, 4)
        wd_in, b_in = init_delayed_synapse(k1, layers[i - 1], layers[i], t_max, sparsity)
        wd_hh, b_hh = init_delayed_synapse(k2, layers[i], layers[i], t_max, sparsity,
                                           zero_weight=zero_hh)
        alpha, rho = init_lif(k3, layers[i])
        params["blocks"].append(dict(wd_in=wd_in, b_in=b_in, wd_hh=wd_hh, b_hh=b_hh,
                                     alpha=alpha, rho=rho))
    key, k1, k2 = jax.random.split(key, 3)
    wd, b = init_delayed_synapse(k1, layers[-1], num_classes, t_max, sparsity)
    alpha, rho = init_lif(k2, num_classes)
    params["fc"] = dict(wd=wd, b=b, alpha=alpha, rho=rho)
    return params


# ----------------------------------------------------------------------------------
# Full DRSNN forward (Pallas) + a pure-JAX reference for validation.
# ----------------------------------------------------------------------------------
def drsnn_forward(x, params, *, t_max, matmul_dtype=jnp.bfloat16):
    # x: [B, T, in]  ->  out: [B, T, num_classes]   (torch.stack(out, dim=1))
    B, T, _ = x.shape
    mm_dtype = jnp.dtype(matmul_dtype)
    cfg = _chip_config()

    hidden_sizes = [blk["wd_in"].shape[2] for blk in params["blocks"]]
    hidden_sizes.append(params["fc"]["wd"].shape[2])
    max_h = max(hidden_sizes)
    in_sizes = [blk["wd_in"].shape[1] for blk in params["blocks"]] + [params["fc"]["wd"].shape[1]]
    inx_est = max(max(in_sizes), _round_up(max_h, LANE))
    bt, Bp, tc = _pick_tiles(T, B, t_max, max_h, inx_est, mm_dtype.itemsize, cfg)
    T_pad = _round_up(T, tc)

    h = jnp.transpose(x, (1, 0, 2)).astype(mm_dtype)          # time-major [T, B, in]
    h = jnp.pad(h, ((0, T_pad - T), (0, Bp - B), (0, 0)))     # pad time / batch (zeros)

    for blk in params["blocks"]:
        h = _run_block(h, blk["wd_in"], blk["b_in"], blk["wd_hh"], blk["b_hh"],
                       blk["alpha"], blk["rho"], t_max=t_max, tc=tc, bt=bt,
                       tn_target=cfg["tn_target"], mm_dtype=mm_dtype, cfg=cfg)
    fc = params["fc"]
    h = _run_block(h, fc["wd"], fc["b"], None, None, fc["alpha"], fc["rho"],
                   t_max=t_max, tc=tc, bt=bt, tn_target=cfg["tn_target"],
                   mm_dtype=mm_dtype, cfg=cfg)

    num_classes = fc["b"].shape[1]
    out = h[:T, :B, :num_classes].astype(jnp.float32)         # drop lane/batch/time padding
    return jnp.transpose(out, (1, 0, 2))


def _block_ref(x_seq, wd_in, b_in, wd_hh, b_hh, alpha, rho, t_max):
    T, B, _ = x_seq.shape
    H = wd_in.shape[2]
    u = jnp.zeros((B, H), jnp.float32)
    eta = jnp.zeros((B, H), jnp.float32)
    hp = lax.Precision.HIGHEST
    outs = []
    for t in range(T):
        # bias-add order mirrors the kernel (hh bias first for t>=1, then ff dots, then hh dots)
        if wd_hh is not None and t >= 1:
            y = jnp.broadcast_to(b_in + b_hh, (B, H))
        else:
            y = jnp.broadcast_to(b_in, (B, H))
        for d in range(t_max):
            if t - d >= 0:
                y = y + jnp.dot(x_seq[t - d], wd_in[d], precision=hp)
        if wd_hh is not None:
            for d in range(t_max):
                if t - 1 - d >= 0:
                    y = y + jnp.dot(outs[t - 1 - d], wd_hh[d], precision=hp)
        u = u * alpha + (1.0 - alpha) * (RM * y)
        vth = B0 + BETA * eta
        spk = (u - vth > 0.0).astype(jnp.float32)
        u = u - spk * (eta * BETA + B0)
        eta = rho * eta + (1.0 - rho) * spk
        outs.append(spk)
    return jnp.stack(outs, 0)


def drsnn_ref(x, params, *, t_max):
    h = jnp.transpose(x, (1, 0, 2)).astype(jnp.float32)
    for blk in params["blocks"]:
        h = _block_ref(h, blk["wd_in"], blk["b_in"], blk["wd_hh"], blk["b_hh"],
                       blk["alpha"], blk["rho"], t_max)
    fc = params["fc"]
    out = _block_ref(h, fc["wd"], fc["b"], None, None, fc["alpha"], fc["rho"], t_max)
    return jnp.transpose(out, (1, 0, 2))


if __name__ == "__main__":
    B, T, t_max = 2, 8, 4
    layers = [16, 32]
    num_classes = 10
    sparsity = 0.3

    key = jax.random.PRNGKey(0)
    kp, kp2, kx = jax.random.split(key, 3)
    # module-default init (hh weight zero-initialised, so recurrent drive = bias only)
    params = init_drsnn(kp, t_max, layers, num_classes, sparsity, zero_hh=True)
    # regression params with non-zero delayed recurrent weights (exercises the hh matmuls
    # and the circular spike-history buffer, t_max > 1)
    params_rec = init_drsnn(kp2, t_max, layers, num_classes, sparsity, zero_hh=False)
    # small integer inputs (exact in bf16) so spike thresholds cannot flip from rounding
    x = jax.random.randint(kx, (B, T, layers[0]), -10, 11).astype(jnp.float32)

    # f32 matmul-operand path: compare against the pure-JAX reference (exact spikes)
    for prm in (params, params_rec):
        out = drsnn_forward(x, prm, t_max=t_max, matmul_dtype=jnp.float32)
        out = jax.block_until_ready(out)
        assert out.shape == (B, T, num_classes)
        ref = drsnn_ref(x, prm, t_max=t_max)
        np.testing.assert_allclose(np.asarray(out), np.asarray(ref), atol=1e-6, rtol=0)

    # bf16 matmul-operand fast path (production default). With integer inputs and 1/64-grid
    # weights every product/accumulation is exact, so spikes must still match the reference.
    out_bf = drsnn_forward(x, params, t_max=t_max, matmul_dtype=jnp.bfloat16)
    out_bf = jax.block_until_ready(out_bf)
    ref = drsnn_ref(x, params, t_max=t_max)
    np.testing.assert_allclose(np.asarray(out_bf), np.asarray(ref), atol=1e-6, rtol=0)

    print("KERNEL_OK")
</pallas_src>

<mosaic_0001>
module attributes {stable_mosaic.version = 11 : i64} {
  func.func @kernel(%arg0: i32, %arg1: i32, %arg2: i32, %arg3: i32, %arg4: memref<8x8x16xf32, #tpu.memory_space<vmem>>, %arg5: memref<8x8x16xf32, #tpu.memory_space<vmem>>, %arg6: memref<1x16x128xf32, #tpu.memory_space<vmem>>, %arg7: memref<1x128xf32, #tpu.memory_space<vmem>>, %arg8: memref<1x128xf32, #tpu.memory_space<vmem>>, %arg9: memref<8x8x128xf32, #tpu.memory_space<vmem>>, %arg10: memref<64x128xf32, #tpu.memory_space<vmem>>, %arg11: memref<16x8x16xf32, #tpu.memory_space<vmem>>) attributes {dimension_semantics = [#tpu.dimension_semantics<parallel>, #tpu.dimension_semantics<parallel>, #tpu.dimension_semantics<parallel>, #tpu.dimension_semantics<arbitrary>], iteration_bounds = array<i64: 1, 1, 1, 4>, scalar_prefetch = 0 : i64, scratch_operands = 2 : i64, tpu.core_type = #tpu.core_type<tc>, window_params = [{transform_indices = @transform_0, window_bounds = array<i64: 8, 8, 16>}, {transform_indices = @transform_1, window_bounds = array<i64: 8, 8, 16>}, {transform_indices = @transform_2, window_bounds = array<i64: 1, 16, 128>}, {transform_indices = @transform_3, window_bounds = array<i64: 1, 128>}, {transform_indices = @transform_4, window_bounds = array<i64: 1, 128>}, {transform_indices = @transform_5, window_bounds = array<i64: 8, 8, 128>}]} {
    %c0_i32 = arith.constant 0 : i32
    %0 = arith.cmpi eq, %arg3, %c0_i32 : i32
    %1 = arith.extui %0 : i1 to i32
    %c0_i32_0 = arith.constant 0 : i32
    %2 = arith.cmpi ne, %1, %c0_i32_0 : i32
    scf.if %2 {
      %c0_i32_10 = arith.constant 0 : i32
      %16 = arith.cmpi eq, %arg0, %c0_i32_10 : i32
      %17 = arith.extui %16 : i1 to i32
      %c0_i32_11 = arith.constant 0 : i32
      %18 = arith.cmpi ne, %17, %c0_i32_11 : i32
      scf.if %18 {
        %cst_25 = arith.constant 0.000000e+00 : f32
        %31 = vector.broadcast %cst_25 : f32 to vector<8x8x16xf32>
        %c0_26 = arith.constant 0 : index
        %c0_27 = arith.constant 0 : index
        %c0_28 = arith.constant 0 : index
        %32 = vector.load %arg11[%c0_26, %c0_27, %c0_28] : memref<16x8x16xf32, #tpu.memory_space<vmem>>, vector<8x8x16xf32>
        tpu.vector_store %arg11[%c0_26, %c0_27, %c0_28], %31 {strides = array<i32>} : memref<16x8x16xf32, #tpu.memory_space<vmem>>, vector<8x8x16xf32>,
      } else {
      }
      %c0_i32_12 = arith.constant 0 : i32
      %19 = arith.cmpi sgt, %arg0, %c0_i32_12 : i32
      %20 = arith.extui %19 : i1 to i32
      %c0_i32_13 = arith.constant 0 : i32
      %21 = arith.cmpi ne, %20, %c0_i32_13 : i32
      scf.if %21 {
        %c0_25 = arith.constant 0 : index
        %c0_26 = arith.constant 0 : index
        %c0_27 = arith.constant 0 : index
        %31 = vector.load %arg4[%c0_25, %c0_26, %c0_27] : memref<8x8x16xf32, #tpu.memory_space<vmem>>, vector<8x8x16xf32>
        %c0_28 = arith.constant 0 : index
        %c0_29 = arith.constant 0 : index
        %c0_30 = arith.constant 0 : index
        %32 = vector.load %arg11[%c0_28, %c0_29, %c0_30] : memref<16x8x16xf32, #tpu.memory_space<vmem>>, vector<8x8x16xf32>
        tpu.vector_store %arg11[%c0_28, %c0_29, %c0_30], %31 {strides = array<i32>} : memref<16x8x16xf32, #tpu.memory_space<vmem>>, vector<8x8x16xf32>,
      } else {
      }
      %c0_14 = arith.constant 0 : index
      %c0_15 = arith.constant 0 : index
      %c0_16 = arith.constant 0 : index
      %22 = vector.load %arg5[%c0_14, %c0_15, %c0_16] : memref<8x8x16xf32, #tpu.memory_space<vmem>>, vector<8x8x16xf32>
      %c8 = arith.constant 8 : index
      %c0_17 = arith.constant 0 : index
      %c0_18 = arith.constant 0 : index
      %23 = vector.load %arg11[%c8, %c0_17, %c0_18] : memref<16x8x16xf32, #tpu.memory_space<vmem>>, vector<8x8x16xf32>
      tpu.vector_store %arg11[%c8, %c0_17, %c0_18], %22 {strides = array<i32>} : memref<16x8x16xf32, #tpu.memory_space<vmem>>, vector<8x8x16xf32>,
      %c0_19 = arith.constant 0 : index
      %c0_20 = arith.constant 0 : index
      %24 = vector.load %arg7[%c0_19, %c0_20] : memref<1x128xf32, #tpu.memory_space<vmem>>, vector<1x128xf32>
      %25 = vector.shape_cast %24 : vector<1x128xf32> to vector<1x128xf32>
      %26 = vector.broadcast %25 : vector<1x128xf32> to vector<64x128xf32>
      %c0_21 = arith.constant 0 : index
      %c0_22 = arith.constant 0 : index
      %27 = vector.load %arg10[%c0_21, %c0_22] : memref<64x128xf32, #tpu.memory_space<vmem>>, vector<64x128xf32>
      tpu.vector_store %arg10[%c0_21, %c0_22], %26 {strides = array<i32>} : memref<64x128xf32, #tpu.memory_space<vmem>>, vector<64x128xf32>,
      %c0_i32_23 = arith.constant 0 : i32
      %28 = arith.cmpi eq, %arg0, %c0_i32_23 : i32
      %29 = arith.extui %28 : i1 to i32
      %c0_i32_24 = arith.constant 0 : i32
      %30 = arith.cmpi ne, %29, %c0_i32_24 : i32
      scf.if %30 {
        %c0_25 = arith.constant 0 : index
        %c0_26 = arith.constant 0 : index
        %31 = vector.load %arg8[%c0_25, %c0_26] : memref<1x128xf32, #tpu.memory_space<vmem>>, vector<1x128xf32>
        %32 = vector.shape_cast %31 : vector<1x128xf32> to vector<1x128xf32>
        %33 = vector.broadcast %32 : vector<1x128xf32> to vector<8x128xf32>
        %c0_27 = arith.constant 0 : index
        %c0_28 = arith.constant 0 : index
        %34 = vector.load %arg10[%c0_27, %c0_28] : memref<64x128xf32, #tpu.memory_space<vmem>>, vector<8x128xf32>
        tpu.vector_store %arg10[%c0_27, %c0_28], %33 {strides = array<i32>} : memref<64x128xf32, #tpu.memory_space<vmem>>, vector<8x128xf32>,
      } else {
      }
    } else {
    }
    %c8_i32 = arith.constant 8 : i32
    %3 = arith.subi %c8_i32, %arg3 : i32
    %4 = arith.index_cast %3 : i32 to index
    %c0 = arith.constant 0 : index
    %c0_1 = arith.constant 0 : index
    %5 = vector.load %arg11[%4, %c0, %c0_1] : memref<16x8x16xf32, #tpu.memory_space<vmem>>, vector<8x8x16xf32>
    %6 = vector.shape_cast %5 : vector<8x8x16xf32> to vector<64x16xf32>
    %c0_2 = arith.constant 0 : index
    %c0_3 = arith.constant 0 : index
    %7 = vector.load %arg10[%c0_2, %c0_3] : memref<64x128xf32, #tpu.memory_space<vmem>>, vector<64x128xf32>
    %c0_4 = arith.constant 0 : index
    %c0_5 = arith.constant 0 : index
    %c0_6 = arith.constant 0 : index
    %8 = vector.load %arg6[%c0_4, %c0_5, %c0_6] : memref<1x16x128xf32, #tpu.memory_space<vmem>>, vector<1x16x128xf32>
    %9 = vector.shape_cast %8 : vector<1x16x128xf32> to vector<16x128xf32>
    %cst = arith.constant dense<0.000000e+00> : vector<64x128xf32>
    %10 = tpu.matmul %6, %9, %cst {dimension_numbers = #tpu.dot_dimension_numbers<[1], [0], [0], [1], [0, 0, 1, 1], [], []>, precision = #tpu.contract_precision<fp32>} : vector<64x16xf32>, vector<16x128xf32>, vector<64x128xf32> -> vector<64x128xf32>
    %11 = arith.addf %7, %10 : vector<64x128xf32>
    %c0_7 = arith.constant 0 : index
    %c0_8 = arith.constant 0 : index
    %12 = vector.load %arg10[%c0_7, %c0_8] : memref<64x128xf32, #tpu.memory_space<vmem>>, vector<64x128xf32>
    tpu.vector_store %arg10[%c0_7, %c0_8], %11 {strides = array<i32>} : memref<64x128xf32, #tpu.memory_space<vmem>>, vector<64x128xf32>,
    %c3_i32 = arith.constant 3 : i32
    %13 = arith.cmpi eq, %arg3, %c3_i32 : i32
    %14 = arith.extui %13 : i1 to i32
    %c0_i32_9 = arith.constant 0 : i32
    %15 = arith.cmpi ne, %14, %c0_i32_9 : i32
    scf.if %15 {
      %c0_10 = arith.constant 0 : index
      %c0_11 = arith.constant 0 : index
      %16 = vector.load %arg10[%c0_10, %c0_11] : memref<64x128xf32, #tpu.memory_space<vmem>>, vector<64x128xf32>
      %17 = vector.shape_cast %16 : vector<64x128xf32> to vector<8x8x128xf32>
      %c0_12 = arith.constant 0 : index
      %c0_13 = arith.constant 0 : index
      %c0_14 = arith.constant 0 : index
      %18 = vector.load %arg9[%c0_12, %c0_13, %c0_14] : memref<8x8x128xf32, #tpu.memory_space<vmem>>, vector<8x8x128xf32>
      tpu.vector_store %arg9[%c0_12, %c0_13, %c0_14], %17 {strides = array<i32>} : memref<8x8x128xf32, #tpu.memory_space<vmem>>, vector<8x8x128xf32>,
    } else {
    }
    return
  }
  func.func @transform_0(%arg0: i32, %arg1: i32, %arg2: i32, %arg3: i32) -> (i32, i32, i32) {
    %c1_i32 = arith.constant 1 : i32
    %0 = arith.subi %arg0, %c1_i32 : i32
    %c0_i32 = arith.constant 0 : i32
    %1 = arith.maxsi %0, %c0_i32 : i32
    %c0_i32_0 = arith.constant 0 : i32
    %c0_i32_1 = arith.constant 0 : i32
    return %1, %arg1, %c0_i32_0 : i32, i32, i32
  }
  func.func @transform_1(%arg0: i32, %arg1: i32, %arg2: i32, %arg3: i32) -> (i32, i32, i32) {
    %c0_i32 = arith.constant 0 : i32
    %c0_i32_0 = arith.constant 0 : i32
    return %arg0, %arg1, %c0_i32 : i32, i32, i32
  }
  func.func @transform_2(%arg0: i32, %arg1: i32, %arg2: i32, %arg3: i32) -> (i32, i32, i32) {
    %c0_i32 = arith.constant 0 : i32
    %c0_i32_0 = arith.constant 0 : i32
    return %arg3, %c0_i32, %arg2 : i32, i32, i32
  }
  func.func @transform_3(%arg0: i32, %arg1: i32, %arg2: i32, %arg3: i32) -> (i32, i32) {
    %c0_i32 = arith.constant 0 : i32
    %c0_i32_0 = arith.constant 0 : i32
    return %c0_i32, %arg2 : i32, i32
  }
  func.func @transform_4(%arg0: i32, %arg1: i32, %arg2: i32, %arg3: i32) -> (i32, i32) {
    %c0_i32 = arith.constant 0 : i32
    %c0_i32_0 = arith.constant 0 : i32
    return %c0_i32, %arg2 : i32, i32
  }
  func.func @transform_5(%arg0: i32, %arg1: i32, %arg2: i32, %arg3: i32) -> (i32, i32, i32) {
    %c0_i32 = arith.constant 0 : i32
    return %arg0, %arg1, %arg2 : i32, i32, i32
  }
}

</mosaic_0001>

<bundles_post_ra>
// kernel: tpu_custom_call.1
= control target key start
LH: loop header
LB: loop body
LE: loop exit
PB: predicated region body
PF: predicated region fallthrough
CT: control target
= control target key end

     0   :  { %10 = vsyncpa [#allocation5], 0  ;;  %s1652_s0 = inlined_call_operand.hbm [shape: f32[8,8,16], index: 0, kind: input, shape index: {}]   ;;  %s1653_s1 = inlined_call_operand.hbm [shape: f32[8,8,16], index: 1, kind: input, shape index: {}]   ;;  %s1654_s2 = inlined_call_operand.hbm [shape: f32[4,16,128], index: 2, kind: input, shape index: {}]   ;;  %s1655_s3 = inlined_call_operand.vmem [shape: f32[1,128], index: 3, kind: input, shape index: {}]   ;;  %s1656_s4 = inlined_call_operand.vmem [shape: f32[1,128], index: 4, kind: input, shape index: {}]   ;;  %s1657_s5 = inlined_call_operand.hbm [shape: f32[8,8,128], index: 5, kind: output, shape index: {}]  }
   0x1   :  { %11 = vsyncpa [#allocation8], 0 }
   0x2   :  { %12 = vsyncpa [#allocation6], 0  ;;  %s1378_s18 = smov 0   ;;  %s1380_s19 = smov 0  }
   0x3   :  { %s1382_s20 = smov 0   ;;  %s1384_s21 = smov 0  }
   0x4   :  { %s1386_s22 = smov 0   ;;  %s1388_s23 = smov 0  }
   0x5 LB: > { %s1407_s24 = sadd.s32 4294967295, %s1338_s23   ;;  %p128_p0 = scmp.ne.s32.totalorder %s1322_s19, %s1318_s18  ;;  %s1338_s23 = sphi %s1388_s23, %s18_s23   ;;  %s1334_s22 = sphi %s1386_s22, %s1667_s22   ;;  %s1330_s21 = sphi %s1384_s21, %s1666_s21   ;;  %s1326_s20 = sphi %s1382_s20, %s1665_s20   ;;  %s1322_s19 = sphi %s1380_s19, %s1664_s19   ;;  %s1318_s18 = sphi %s1378_s18, %s1663_s18  }
   0x6   : > { %p129_p1 = scmp.eq.s32.totalorder %s1407_s24, 0  ;;  %p1043_p2 = scmp.ge.s32.totalorder %s1338_s23, 1 }
   0x7   : > { %p221_p3 = scmp.lt.s32.totalorder %s1338_s23, 5  ;;  %s239_s28 = sshll.u32 %s1652_s0, 4  ;;  %s240_s28 = int_to_ptr.hbm [resolvable:$true] %s239_s28 }
   0x8   : > { %p1415_p4 = por %p129_p1, %p128_p0  ;;  %s1340_s30 = smov [#allocation4]  }
   0x9   : > { %p1422_p5 = pnand %p1043_p2, %p221_p3  ;;  %s241_s6 = sshll.u32 %s1340_s30, 4  ;;  %s242_s6 = int_to_ptr.vmem [resolvable:$true] %s241_s6 }
   0xa   : > { %s257_s9 = sshll.u32 %s1653_s1, 4  ;;  %s1658_s10 = smov 128   ;;  %s258_s9 = int_to_ptr.hbm [resolvable:$true] %s257_s9 }
   0xb   : > { %p1082_p6 = pneg %p1422_p5  ;;  %s1342_s11 = smov 8  }
   0xc   : > { %s1343_s12 = smov [#allocation7]   ;;  %s33_s14 = sadd.s32 1, %s1334_s22 }
   0xd   : > { %p1083_p7 = pnand %p1082_p6, %p129_p1  ;;  %s259_s13 = sshll.u32 %s1343_s12, 4  ;;  %s260_s13 = int_to_ptr.vmem [resolvable:$true] %s259_s13 }
   0xe   : > { %p34_p8 = scmp.ge.s32.totalorder %s33_s14, 4  ;;  %p122_p9 = scmp.ne.s32.totalorder %s1326_s20, %s1322_s19 }
   0xf   : > { %1085 = dma.hbm_to_vmem [thread:$0]  (!%p1083_p7), %s240_s28, 1024, %s242_s6, [#allocation5], %s1658_s10, %s1658_s10, %s1342_s11  }
  0x10   : > { %1088 = dma.hbm_to_vmem [thread:$0]  (!%p1083_p7), %s258_s9, 1024, %s260_s13, [#allocation8], %s1658_s10, %s1658_s10, %s1342_s11  }
  0x11   : > { %s115_s15 = sadd.s32 1, %s1326_s20  ;;  %p123_p10 = scmp.eq.s32.totalorder %s1338_s23, 0 }
  0x12   : > { %s1669_s14 = smov (%p34_p8, %s33_s14), 0  ;;  %p1095_p12 = scmp.lt.s32.totalorder %s1338_s23, 4 }
  0x13   : > { %p1446_p11 = por %p123_p10, %p122_p9  ;;  %s110_s17 = ssub.s32 %s1334_s22, %s1669_s14 }
  0x14   : > { %s285_s18 = sand.u32 1, %s1338_s23   ;;  %p113_p13 = scmp.eq.s32.totalorder %s110_s17, 0 }
  0x15   : > { %s287_s26 = sand.u32 1, %s1326_s20   ;;  %s1063_s28 = sshll.u32 %s1334_s22, 4 }
  0x16   : > { %s1049_s27 = sshll.u32 %s287_s26, 4  ;;  %s295_s8 = scalar_lea.hbm %s1654_s2, %s1063_s28 }
  0x17   : > { %s1457_s30 = scalar_select %p113_p13, %s1326_s20, %s115_s15  }
  0x18   : > { %s296_s9 = sshll.u32 %s295_s8, 4  ;;  %s289_s12 = scalar_lea.vmem [#allocation9], %s1049_s27  ;;  %s297_s9 = int_to_ptr.hbm [resolvable:$true] %s296_s9 }
  0x19   : > { %s298_s13 = sshll.u32 %s289_s12, 4  ;;  %p1090_p0 = pnand %p1095_p12, %p1446_p11  ;;  %s299_s13 = int_to_ptr.vmem [resolvable:$true] %s298_s13 }
  0x1a   : > { %s286_s10 = scalar_lea.sflag [#allocation5], %s285_s18  ;;  %s1662_s17 = smov 128  }
  0x1b   : > { %1092 = dma.hbm_to_vmem [thread:$0]  (!%p1090_p0), %s297_s9, 256, %s299_s13, %s286_s10, %s1662_s17, %s1662_s17, %s1342_s11  }
  0x1c   : > { %310 = sbr.rel (%p1422_p5) target bundleno = 335 (0x14f), region = 40 }
  0x21   : > { %1301 = dma.done.wait (%p129_p1), [#allocation5], 1024  }
  0x22   : > { %1303 = vsyncadd (%p129_p1), [#allocation5], 4294966272 }
  0x23   : > { %1305 = dma.done.wait (%p129_p1), [#allocation8], 1024  }
  0x24   : > { %1307 = vsyncadd (%p129_p1), [#allocation8], 4294966272  ;;  %s322_s15 = sand.u32 1, %s1407_s24   ;;  %s324_s10 = sand.u32 1, %s1322_s19  }
  0x25   : > { %s1481_s11 = sshll.u32 %s324_s10, 4  ;;  %s323_s29 = scalar_lea.sflag [#allocation5], %s322_s15 }
  0x26   : > { %s326_s16 = scalar_lea.vmem [#allocation9], %s1481_s11 }
  0x27   : > { %1309 = dma.done.wait (%p1415_p4), %s323_s29, 256  }
  0x28   : > { %1311 = vsyncadd (%p1415_p4), %s323_s29, 4294967040  ;;  %p1056_p2 = scmp.ne.s32.totalorder %s1330_s21, 0 }
  0x2a   : > { %370 = sbr.rel (%p1056_p2) target bundleno = 72 (0x48), region = 56 }
  0x2f   : > { %v1156_v0 = vld [vmem:[%s1655_s3] ss:$0 sm:$0xff]  ;;  %vm375_vm0 = vcmask 130048   ;;  %v1344_v1 = vmov 0.0   ;;  %v406_v3 = vld [vmem:[#allocation7 + $0x8] sm:$0xff]  ;;  %v407_v4 = vld [vmem:[#allocation7 + $0x10] sm:$0xff] }
  0x30   : > { %376 = vst.msk [vmem:[#allocation3] sm:$0xff] %vm375_vm0, %v1344_v1  ;;  %v405_v2 = vld [vmem:[#allocation7] sm:$0xff]  ;;  %v408_v5 = vld [vmem:[#allocation7 + $0x18] sm:$0xff]  ;;  %v410_v7 = vld [vmem:[#allocation7 + $0x28] sm:$0xff] }
  0x31   : > { %428 = vst [vmem:[#allocation2] sm:$0xff] %v1156_v0  ;;  %v409_v6 = vld [vmem:[#allocation7 + $0x20] sm:$0xff]  ;;  %v411_v8 = vld [vmem:[#allocation7 + $0x30] sm:$0xff]  ;;  %v412_v9 = vld [vmem:[#allocation7 + $0x38] sm:$0xff] }
  0x32   : > { %429 = vst [vmem:[#allocation2 + $0x18] sm:$0xff] %v1156_v0  ;;  %v1157_v10 = vld [vmem:[%s1656_s4] ss:$0 sm:$0xff] }
  0x33   : > { %430 = vst [vmem:[#allocation2 + $0x10] sm:$0xff] %v1156_v0 }
  0x34   : > { %431 = vst [vmem:[#allocation2 + $0x8] sm:$0xff] %v1156_v0 }
  0x35   : > { %432 = vst [vmem:[#allocation2 + $0x20] sm:$0xff] %v1156_v0 }
  0x36   : > { %433 = vst [vmem:[#allocation2 + $0x28] sm:$0xff] %v1156_v0 }
  0x37   : > { %434 = vst [vmem:[#allocation2 + $0x38] sm:$0xff] %v1156_v0 }
  0x38   : > { %377 = vst.msk [vmem:[#allocation3 + $0x8] sm:$0xff] %vm375_vm0, %v1344_v1 }
  0x39   : > { %378 = vst.msk [vmem:[#allocation3 + $0x10] sm:$0xff] %vm375_vm0, %v1344_v1 }
  0x3a   : > { %379 = vst.msk [vmem:[#allocation3 + $0x18] sm:$0xff] %vm375_vm0, %v1344_v1 }
  0x3b   : > { %380 = vst.msk [vmem:[#allocation3 + $0x20] sm:$0xff] %vm375_vm0, %v1344_v1 }
  0x3c   : > { %381 = vst.msk [vmem:[#allocation3 + $0x28] sm:$0xff] %vm375_vm0, %v1344_v1 }
  0x3d   : > { %382 = vst.msk [vmem:[#allocation3 + $0x30] sm:$0xff] %vm375_vm0, %v1344_v1 }
  0x3e   : > { %383 = vst.msk [vmem:[#allocation3 + $0x38] sm:$0xff] %vm375_vm0, %v1344_v1 }
  0x3f   : > { %415 = vst.msk [vmem:[#allocation3 + $0x40] sm:$0xff] %vm375_vm0, %v405_v2 }
  0x40   : > { %416 = vst.msk [vmem:[#allocation3 + $0x48] sm:$0xff] %vm375_vm0, %v406_v3 }
  0x41   : > { %417 = vst.msk [vmem:[#allocation3 + $0x50] sm:$0xff] %vm375_vm0, %v407_v4 }
  0x42   : > { %418 = vst.msk [vmem:[#allocation3 + $0x58] sm:$0xff] %vm375_vm0, %v408_v5 }
  0x43   : > { %419 = vst.msk [vmem:[#allocation3 + $0x60] sm:$0xff] %vm375_vm0, %v409_v6 }
  0x44   : > { %420 = vst.msk [vmem:[#allocation3 + $0x68] sm:$0xff] %vm375_vm0, %v410_v7 }
  0x45   : > { %421 = vst.msk [vmem:[#allocation3 + $0x70] sm:$0xff] %vm375_vm0, %v411_v8 }
  0x46   : > { %422 = vst.msk [vmem:[#allocation3 + $0x78] sm:$0xff] %vm375_vm0, %v412_v9 }
  0x47   : > { %442 = vst [vmem:[#allocation2 + $0x30] sm:$0xff] %v1157_v10 }
  0x48 PF: > { %v463_v11 = vld [vmem:[%s326_s16 + $0x8] sm:$0xff]  ;;  %v462_v12 = vld [vmem:[%s326_s16] sm:$0xff]  ;;  %s443_s28 = ssub.s32 8, %s1330_s21  ;;  %vm464_vm1 = vcmask 130048   ;;  %p1058_p1 = scmp.ne.s32.totalorder %s1330_s21, 3 }
  0x49   : > { %v1516_v13 = vand.u32 4294901760, %v463_v11  ;;  %v1518_v14 = vand.u32 4294901760, %v462_v12  ;;  %s1057_s6 = sshll.u32 %s443_s28, 3 }
  0x4a   : > { %s1523_s7 = scalar_lea.vmem [#allocation3], %s1057_s6 }
  0x4b   : > { %1064 = vmatpush.msra.mxu2 %v1516_v13  ;;  %v587_v15 = vsub.f32 %v463_v11, %v1516_v13  ;;  %v593_v16 = vsub.f32 %v462_v12, %v1518_v14  ;;  %504 = vmatpush.msra.mxu0 %v1516_v13 }
  0x4d   : > { %v450_v17 = vld [vmem:[%s1523_s7 + $0x20] sm:$0xff]  ;;  %v451_v18 = vld [vmem:[%s1523_s7 + $0x28] sm:$0xff]  ;;  %v588_v24 = vand.u32 4294901760, %v587_v15  ;;  %1065 = vmatpush.msra.mxu2 %v1518_v14  ;;  %v594_v25 = vand.u32 4294901760, %v593_v16  ;;  %506 = vmatpush.msra.mxu0 %v1518_v14  ;;  %v452_v28 = vld [vmem:[%s1523_s7 + $0x30] sm:$0xff] }
  0x4e   : > { %v446_v19 = vld [vmem:[%s1523_s7] sm:$0xff]  ;;  %v478_v20 = vsel %vm464_vm1, %v450_v17, 0  ;;  %v481_v21 = vsel %vm464_vm1, %v451_v18, 0  ;;  %v447_v23 = vld [vmem:[%s1523_s7 + $0x8] sm:$0xff]  ;;  %v484_v36 = vsel %vm464_vm1, %v452_v28, 0  ;;  %v448_v38 = vld [vmem:[%s1523_s7 + $0x10] sm:$0xff] }
  0x4f   : > { %v466_v22 = vsel %vm464_vm1, %v446_v19, 0  ;;  %v1534_v26 = vand.u32 4294901760, %v478_v20  ;;  %v1536_v27 = vand.u32 4294901760, %v481_v21  ;;  %647 = vmatpush.msrb.mxu2 %v587_v15  ;;  %v469_v30 = vsel %vm464_vm1, %v447_v23, 0  ;;  %776 = vmatpush.msrb.mxu0 %v588_v24  ;;  %v453_v51 = vld [vmem:[%s1523_s7 + $0x38] sm:$0xff] }
  0x50   : > { %v1540_v29 = vand.u32 4294901760, %v466_v22  ;;  %v589_v31 = vsub.f32 %v587_v15, %v588_v24  ;;  %v595_v32 = vsub.f32 %v593_v16, %v594_v25  ;;  %v1553_v37 = vand.u32 4294901760, %v469_v30  ;;  %v449_v54 = vld [vmem:[%s1523_s7 + $0x18] sm:$0xff] }
  0x51   : > { %v1544_v33 = vsub.f32 %v478_v20, %v1534_v26  ;;  %v1547_v34 = vsub.f32 %v481_v21, %v1536_v27  ;;  %650 = vmatpush.msrb.mxu2 %v593_v16  ;;  %780 = vmatpush.msrb.mxu0 %v594_v25  ;;  %v1565_v46 = vand.u32 4294901760, %v484_v36  ;;  %v472_v47 = vsel %vm464_vm1, %v448_v38, 0 }
  0x52   : > { %v1550_v35 = vsub.f32 %v466_v22, %v1540_v29  ;;  %v590_v39 = vand.u32 4294901760, %v589_v31  ;;  %v596_v40 = vand.u32 4294901760, %v595_v32  ;;  %v1559_v43 = vsub.f32 %v469_v30, %v1553_v37 }
  0x53   : > { %v541_v41 = vand.u32 4294901760, %v1544_v33  ;;  %v549_v45 = vand.u32 4294901760, %v1547_v34  ;;  %v523_v52 = vand.u32 4294901760, %v472_v47  ;;  %v1579_v56 = vsub.f32 %v484_v36, %v1565_v46 }
  0x54   : > { %v509_v42 = vand.u32 4294901760, %v1550_v35  ;;  %1066 = vmatpush.msra.mxu3 %v590_v39  ;;  %591 = vmatpush.msra.mxu1 %v590_v39  ;;  %v517_v49 = vand.u32 4294901760, %v1559_v43  ;;  %v487_v58 = vsel %vm464_vm1, %v453_v51, 0  ;;  %v475_v60 = vsel %vm464_vm1, %v449_v54, 0 }
  0x55   : > { %v542_v44 = vsub.f32 %v1544_v33, %v541_v41  ;;  %v550_v55 = vsub.f32 %v1547_v34, %v549_v45  ;;  %v524_v59 = vsub.f32 %v472_v47, %v523_v52  ;;  %v557_v62 = vand.u32 4294901760, %v1579_v56 }
  0x56   : > { %v510_v48 = vsub.f32 %v1550_v35, %v509_v42  ;;  %1067 = vmatpush.msra.mxu3 %v596_v40  ;;  %597 = vmatpush.msra.mxu1 %v596_v40  ;;  %v518_v57 = vsub.f32 %v1559_v43, %v517_v49  ;;  %v563_v63 = vand.u32 4294901760, %v487_v58  ;;  %v531_v2 = vand.u32 4294901760, %v475_v60 }
  0x57   : > { %v543_v50 = vand.u32 4294901760, %v542_v44  ;;  %615 = vmatmul.f32.vlgmr.msra.gmra.mxu3 %v1534_v26  ;;  %599 = vmatmul.f32.vlgmr.msra.gmra.mxu1 %v1540_v29  ;;  %v551_v61 = vand.u32 4294901760, %v550_v55  ;;  %v525_v1 = vand.u32 4294901760, %v524_v59  ;;  %v558_v3 = vsub.f32 %v1579_v56, %v557_v62 }
  0x58   : > { %v511_v53 = vand.u32 4294901760, %v510_v48  ;;  %707 = vmatpush.msrb.mxu3 %v1516_v13  ;;  %829 = vmatpush.msrb.mxu1 %v1516_v13  ;;  %v519_v0 = vand.u32 4294901760, %v518_v57  ;;  %v564_v4 = vsub.f32 %v487_v58, %v563_v63  ;;  %v532_v6 = vsub.f32 %v475_v60, %v531_v2 }
  0x59   : > { %544 = vmatmul.f32.vlgmr.msra.gmra.mxu2 %v543_v50  ;;  %v526_v5 = vsub.f32 %v524_v59, %v525_v1  ;;  %v559_v7 = vand.u32 4294901760, %v558_v3 }
  0x5a   : > { %512 = vmatmul.f32.vlgmr.msra.gmra.mxu0 %v511_v53  ;;  %709 = vmatpush.msrb.mxu3 %v1518_v14  ;;  %v565_v8 = vand.u32 4294901760, %v564_v4  ;;  %v533_v10 = vand.u32 4294901760, %v532_v6 }
  0x5b   : > { %831 = vmatpush.msrb.mxu1 %v1518_v14  ;;  %v527_v9 = vand.u32 4294901760, %v526_v5 }
  0x5c   : > { %v566_v11 = vsub.f32 %v564_v4, %v565_v8  ;;  %v534_v12 = vsub.f32 %v532_v6, %v533_v10 }
  0x5e   : > { %v567_v13 = vand.u32 4294901760, %v566_v11  ;;  %v535_v14 = vand.u32 4294901760, %v534_v12 }
  0x5f   : > { %619 = vmatmul.f32.gmra.mxu3 %v1536_v27  ;;  %603 = vmatmul.f32.gmra.mxu1 %v1553_v37 }
  0x61   : > { %552 = vmatmul.f32.gmra.mxu2 %v551_v61 }
  0x62   : > { %520 = vmatmul.f32.gmra.mxu0 %v519_v0 }
  0x67   : > { %623 = vmatmul.f32.gmra.mxu3 %v1565_v46  ;;  %607 = vmatmul.f32.gmra.mxu1 %v523_v52 }
  0x69   : > { %560 = vmatmul.f32.gmra.mxu2 %v559_v7 }
  0x6a   : > { %528 = vmatmul.f32.gmra.mxu0 %v527_v9  ;;  %v457_v9 = vld [vmem:[#allocation2 + $0x10] sm:$0xff] }
  0x6f   : > { %627 = vmatmul.f32.gmra.mxu3 %v563_v63  ;;  %611 = vmatmul.f32.gmra.mxu1 %v531_v2 }
  0x71   : > { %568 = vmatmul.f32.gmra.mxu2 %v567_v13 }
  0x72   : > { %536 = vmatmul.f32.gmra.mxu0 %v535_v14 }
  0x77   : > { %713 = vmatmul.f32.vlgmr.msrb.gmra.mxu3 %v509_v42  ;;  %833 = vmatmul.f32.vlgmr.msrb.gmra.mxu1 %v1540_v29 }
  0x79   : > { %653 = vmatmul.f32.vlgmr.msrb.gmra.mxu2 %v1550_v35 }
  0x7a   : > { %782 = vmatmul.f32.vlgmr.msrb.gmra.mxu0 %v1540_v29 }
  0x7f   : > { %719 = vmatmul.f32.gmra.mxu3 %v517_v49  ;;  %837 = vmatmul.f32.gmra.mxu1 %v1553_v37 }
  0x81   : > { %658 = vmatmul.f32.gmra.mxu2 %v1559_v43 }
  0x82   : > { %786 = vmatmul.f32.gmra.mxu0 %v1553_v37 }
  0x87   : > { %725 = vmatmul.f32.gmra.mxu3 %v525_v1  ;;  %841 = vmatmul.f32.gmra.mxu1 %v523_v52 }
  0x89   : > { %663 = vmatmul.f32.gmra.mxu2 %v524_v59 }
  0x8a   : > { %790 = vmatmul.f32.gmra.mxu0 %v523_v52  ;;  %v455_v52 = vld [vmem:[#allocation2] sm:$0xff] }
  0x8f   : > { %731 = vmatmul.f32.gmra.mxu3 %v533_v10  ;;  %845 = vmatmul.f32.gmra.mxu1 %v531_v2 }
  0x91   : > { %668 = vmatmul.f32.gmra.mxu2 %v532_v6 }
  0x92   : > { %794 = vmatmul.f32.gmra.mxu0 %v531_v2 }
  0x97   : > { %737 = vmatmul.f32.gmra.mxu3 %v541_v41  ;;  %849 = vmatmul.f32.gmra.mxu1 %v1534_v26  ;;  %v454_v41 = vld [vmem:[#allocation2 + $0x30] sm:$0xff] }
  0x99   : > { %673 = vmatmul.f32.gmra.mxu2 %v1544_v33 }
  0x9a   : > { %798 = vmatmul.f32.gmra.mxu0 %v1534_v26 }
  0x9f   : > { %743 = vmatmul.f32.gmra.mxu3 %v549_v45  ;;  %853 = vmatmul.f32.gmra.mxu1 %v1536_v27 }
  0xa1   : > { %678 = vmatmul.f32.gmra.mxu2 %v1547_v34 }
  0xa2   : > { %802 = vmatmul.f32.gmra.mxu0 %v1536_v27 }
  0xa7   : > { %749 = vmatmul.f32.gmra.mxu3 %v557_v62  ;;  %857 = vmatmul.f32.gmra.mxu1 %v1565_v46 }
  0xa9   : > { %683 = vmatmul.f32.gmra.mxu2 %v1579_v56 }
  0xaa   : > { %806 = vmatmul.f32.gmra.mxu0 %v1565_v46 }
  0xaf   : > { %755 = vmatmul.f32.gmra.mxu3 %v565_v8  ;;  %861 = vmatmul.f32.gmra.mxu1 %v563_v63 }
  0xb1   : > { %688 = vmatmul.f32.gmra.mxu2 %v564_v4 }
  0xb2   : > { %810 = vmatmul.f32.gmra.mxu0 %v563_v63  ;;  %v456_v63 = vld [vmem:[#allocation2 + $0x18] sm:$0xff] }
  0xd4   : > { %v600_v15 = vpop.f32.mrf.mxu1 }
  0xd7   : > { %v513_v16 = vpop.f32.mrf.mxu0 }
  0xd8   : > { %v601_v33 = vadd.f32 %v600_v15, %v513_v16 }
  0xda   : > { %v616_v17 = vpop.f32.mrf.mxu3 }
  0xdc   : > { %v545_v18 = vpop.f32.mrf.mxu2  ;;  %v604_v19 = vpop.f32.mrf.mxu1 }
  0xdd   : > { %v617_v11 = vadd.f32 %v616_v17, %v545_v18 }
  0xdf   : > { %v521_v20 = vpop.f32.mrf.mxu0 }
  0xe0   : > { %v605_v42 = vadd.f32 %v604_v19, %v521_v20 }
  0xe2   : > { %v1611_v21 = vpop.f32.mrf.mxu3 }
  0xe4   : > { %v1613_v22 = vpop.f32.mrf.mxu2  ;;  %v608_v23 = vpop.f32.mrf.mxu1 }
  0xe7   : > { %v529_v24 = vpop.f32.mrf.mxu0 }
  0xe8   : > { %v609_v53 = vadd.f32 %v608_v23, %v529_v24  ;;  %v458_v23 = vld [vmem:[#allocation2 + $0x8] sm:$0xff] }
  0xea   : > { %v1615_v25 = vpop.f32.mrf.mxu3 }
  0xec   : > { %v1617_v26 = vpop.f32.mrf.mxu2  ;;  %v612_v27 = vpop.f32.mrf.mxu1 }
  0xef   : > { %v537_v28 = vpop.f32.mrf.mxu0 }
  0xf0   : > { %v613_v0 = vadd.f32 %v612_v27, %v537_v28  ;;  %v621_v27 = vadd.f32 %v1611_v21, %v1613_v22 }
  0xf2   : > { %v1619_v29 = vpop.f32.mrf.mxu3 }
  0xf4   : > { %v1621_v30 = vpop.f32.mrf.mxu2  ;;  %v834_v31 = vpop.f32.mrf.mxu1 }
  0xf7   : > { %v783_v32 = vpop.f32.mrf.mxu0 }
  0xfa   : > { %v714_v34 = vpop.f32.mrf.mxu3 }
  0xfc   : > { %v654_v35 = vpop.f32.mrf.mxu2  ;;  %v838_v37 = vpop.f32.mrf.mxu1 }
  0xfd   : > { %v655_v36 = vadd.f32 %v654_v35, %v601_v33 }
  0xff   : > { %v715_v38 = vadd.f32 %v714_v34, %v655_v36  ;;  %v787_v39 = vpop.f32.mrf.mxu0  ;;  %v459_v36 = vld [vmem:[#allocation2 + $0x20] sm:$0xff] }
 0x101   : > { %v784_v40 = vadd.f32 %v783_v32, %v715_v38 }
 0x102   : > { %v720_v44 = vpop.f32.mrf.mxu3 }
 0x103   : > { %v835_v43 = vadd.f32 %v834_v31, %v784_v40 }
 0x104   : > { %v659_v45 = vpop.f32.mrf.mxu2  ;;  %v842_v48 = vpop.f32.mrf.mxu1 }
 0x105   : > { %v865_v46 = vadd.f32 %v835_v43, %v454_v41  ;;  %v660_v47 = vadd.f32 %v659_v45, %v605_v42  ;;  %v460_v45 = vld [vmem:[#allocation2 + $0x28] sm:$0xff] }
 0x107   : > { %873 = vst [vmem:[#allocation2 + $0x30] sm:$0xff] %v865_v46  ;;  %v721_v49 = vadd.f32 %v720_v44, %v660_v47  ;;  %v791_v50 = vpop.f32.mrf.mxu0  ;;  %v629_v46 = vadd.f32 %v1619_v29, %v1621_v30 }
 0x109   : > { %v788_v51 = vadd.f32 %v787_v39, %v721_v49 }
 0x10a   : > { %v726_v55 = vpop.f32.mrf.mxu3 }
 0x10b   : > { %v839_v54 = vadd.f32 %v838_v37, %v788_v51  ;;  %v625_v37 = vadd.f32 %v1615_v25, %v1617_v26 }
 0x10c   : > { %v664_v56 = vpop.f32.mrf.mxu2  ;;  %v846_v61 = vpop.f32.mrf.mxu1 }
 0x10d   : > { %v866_v57 = vadd.f32 %v839_v54, %v455_v52  ;;  %v665_v58 = vadd.f32 %v664_v56, %v609_v53  ;;  %v461_v54 = vld [vmem:[#allocation2 + $0x38] sm:$0xff] }
 0x10f   : > { %874 = vst [vmem:[#allocation2] sm:$0xff] %v866_v57  ;;  %v727_v59 = vadd.f32 %v726_v55, %v665_v58  ;;  %v795_v60 = vpop.f32.mrf.mxu0 }
 0x111   : > { %v792_v62 = vadd.f32 %v791_v50, %v727_v59 }
 0x112   : > { %v732_v2 = vpop.f32.mrf.mxu3 }
 0x113   : > { %v843_v1 = vadd.f32 %v842_v48, %v792_v62 }
 0x114   : > { %v669_v3 = vpop.f32.mrf.mxu2  ;;  %v850_v10 = vpop.f32.mrf.mxu1 }
 0x115   : > { %v867_v4 = vadd.f32 %v843_v1, %v456_v63  ;;  %v670_v5 = vadd.f32 %v669_v3, %v613_v0 }
 0x117   : > { %875 = vst [vmem:[#allocation2 + $0x18] sm:$0xff] %v867_v4  ;;  %v733_v6 = vadd.f32 %v732_v2, %v670_v5  ;;  %v799_v7 = vpop.f32.mrf.mxu0 }
 0x119   : > { %v796_v8 = vadd.f32 %v795_v60, %v733_v6 }
 0x11a   : > { %v738_v13 = vpop.f32.mrf.mxu3 }
 0x11b   : > { %v847_v12 = vadd.f32 %v846_v61, %v796_v8 }
 0x11c   : > { %v674_v14 = vpop.f32.mrf.mxu2  ;;  %v854_v33 = vpop.f32.mrf.mxu1 }
 0x11d   : > { %v868_v15 = vadd.f32 %v847_v12, %v457_v9  ;;  %v675_v16 = vadd.f32 %v674_v14, %v617_v11 }
 0x11f   : > { %876 = vst [vmem:[#allocation2 + $0x10] sm:$0xff] %v868_v15  ;;  %v739_v19 = vadd.f32 %v738_v13, %v675_v16  ;;  %v803_v24 = vpop.f32.mrf.mxu0 }
 0x121   : > { %v800_v20 = vadd.f32 %v799_v7, %v739_v19 }
 0x122   : > { %v744_v31 = vpop.f32.mrf.mxu3 }
 0x123   : > { %v851_v28 = vadd.f32 %v850_v10, %v800_v20 }
 0x124   : > { %v679_v32 = vpop.f32.mrf.mxu2  ;;  %v858_v21 = vpop.f32.mrf.mxu1 }
 0x125   : > { %v869_v34 = vadd.f32 %v851_v28, %v458_v23  ;;  %v680_v35 = vadd.f32 %v679_v32, %v621_v27 }
 0x127   : > { %877 = vst [vmem:[#allocation2 + $0x8] sm:$0xff] %v869_v34  ;;  %v745_v17 = vadd.f32 %v744_v31, %v680_v35  ;;  %v807_v41 = vpop.f32.mrf.mxu0 }
 0x129   : > { %v804_v18 = vadd.f32 %v803_v24, %v745_v17 }
 0x12a   : > { %v750_v39 = vpop.f32.mrf.mxu3 }
 0x12b   : > { %v855_v38 = vadd.f32 %v854_v33, %v804_v18 }
 0x12c   : > { %v684_v40 = vpop.f32.mrf.mxu2  ;;  %v862_v52 = vpop.f32.mrf.mxu1 }
 0x12d   : > { %v870_v42 = vadd.f32 %v855_v38, %v459_v36  ;;  %v685_v43 = vadd.f32 %v684_v40, %v625_v37 }
 0x12f   : > { %878 = vst [vmem:[#allocation2 + $0x20] sm:$0xff] %v870_v42  ;;  %v751_v22 = vadd.f32 %v750_v39, %v685_v43  ;;  %v811_v25 = vpop.f32.mrf.mxu0 }
 0x131   : > { %v808_v44 = vadd.f32 %v807_v41, %v751_v22 }
 0x132   : > { %v756_v49 = vpop.f32.mrf.mxu3 }
 0x133   : > { %v859_v47 = vadd.f32 %v858_v21, %v808_v44 }
 0x134   : > { %v689_v48 = vpop.f32.mrf.mxu2 }
 0x135   : > { %v871_v50 = vadd.f32 %v859_v47, %v460_v45  ;;  %v690_v51 = vadd.f32 %v689_v48, %v629_v46 }
 0x137   : > { %879 = vst [vmem:[#allocation2 + $0x28] sm:$0xff] %v871_v50  ;;  %v757_v26 = vadd.f32 %v756_v49, %v690_v51 }
 0x139   : > { %v812_v53 = vadd.f32 %v811_v25, %v757_v26 }
 0x13b   : > { %v863_v55 = vadd.f32 %v862_v52, %v812_v53  ;;  %884 = sbr.rel (%p1058_p1) target bundleno = 329 (0x149), region = 72 }
 0x13d   : > { %v872_v56 = vadd.f32 %v863_v55, %v461_v54 }
 0x13f   : > { %880 = vst [vmem:[#allocation2 + $0x38] sm:$0xff] %v872_v56 }
 0x140   : > { %v885_v57 = vld [vmem:[#allocation2 + $0x30] sm:$0xff]  ;;  %v886_v58 = vld [vmem:[#allocation2] sm:$0xff]  ;;  %v887_v29 = vld [vmem:[#allocation2 + $0x18] sm:$0xff] }
 0x141   : > { %893 = vst [vmem:[#allocation10] sm:$0xff] %v885_v57  ;;  %v888_v30 = vld [vmem:[#allocation2 + $0x10] sm:$0xff]  ;;  %v889_v59 = vld [vmem:[#allocation2 + $0x8] sm:$0xff]  ;;  %v890_v60 = vld [vmem:[#allocation2 + $0x20] sm:$0xff] }
 0x142   : > { %894 = vst [vmem:[#allocation10 + $0x8] sm:$0xff] %v886_v58  ;;  %v891_v61 = vld [vmem:[#allocation2 + $0x28] sm:$0xff] }
 0x143   : > { %895 = vst [vmem:[#allocation10 + $0x10] sm:$0xff] %v887_v29 }
 0x144   : > { %896 = vst [vmem:[#allocation10 + $0x18] sm:$0xff] %v888_v30 }
 0x145   : > { %897 = vst [vmem:[#allocation10 + $0x20] sm:$0xff] %v889_v59 }
 0x146   : > { %v892_v62 = vld [vmem:[#allocation2 + $0x38] sm:$0xff]  ;;  %898 = vst [vmem:[#allocation10 + $0x28] sm:$0xff] %v890_v60 }
 0x147   : > { %899 = vst [vmem:[#allocation10 + $0x30] sm:$0xff] %v891_v61 }
 0x148   : > { %900 = vst [vmem:[#allocation10 + $0x38] sm:$0xff] %v892_v62 }
 0x149 PF: > { %p1098_p3 = scmp.eq.s32.totalorder %s1407_s24, 3  ;;  %s913_s9 = sshll.u32 %s1657_s5, 4  ;;  %s914_s9 = int_to_ptr.hbm [resolvable:$true] %s913_s9 }
 0x14a   : > { %s1345_s12 = smov [#allocation10]   ;;  %s1346_s17 = smov 128  }
 0x14b   : > { %s911_s13 = sshll.u32 %s1345_s12, 4  ;;  %s1347_s15 = smov 8   ;;  %s912_s13 = int_to_ptr.vmem [resolvable:$true] %s911_s13 }
 0x14c   : > { %1079 = dma.vmem_to_hbm [thread:$0]  (%p1098_p3), %s912_s13, 1024, %s914_s9, [#allocation6], %s1346_s17, %s1346_s17, %s1347_s15  }
 0x14d   : > { %1313 = dma.done.wait (%p1098_p3), [#allocation6], 1024  }
 0x14e   : > { %1315 = vsyncadd (%p1098_p3), [#allocation6], 4294966272 }
 0x14f PF: > { %s18_s23 = sadd.s32 1, %s1338_s23   ;;  %s1663_s18 = smov %s1322_s19 }
 0x150   : > { %p15_p4 = scmp.ge.s32.totalorder %s18_s23, 6   ;;  %s1664_s19 = smov %s1326_s20 }
 0x151   : > { %s1665_s20 = smov %s1457_s30  ;;  %s1666_s21 = smov %s1334_s22 }
 0x152   : > { %s1667_s22 = smov %s1669_s14  ;;  %17 = sbr.rel (!%p15_p4) target bundleno = 5 (0x5), region = 115 }
 0x157   :  { %930 = vsyncpa [#allocation5], 1 }
 0x158   :  { %932 = vsyncpa [#allocation5 + $0x1], 1 }
 0x159   :  { %933 = vsyncpa [#allocation8], 1 }
 0x15a   :  { %934 = vsyncpa [#allocation6], 1 }
 0x15b   :  { %936 = vsyncpa [#allocation6 + $0x1], 1 }

</bundles_post_ra>
